<compile_context>
chip_gen: v7x
topology: tpu7x:2x2x1
jax: 0.10.0
libtpu: 0.0.40
codegen_flags: <defaults>
</compile_context>

<pallas_src>
import math
import numpy as np
import jax
import jax.numpy as jnp
from jax import lax
from jax.experimental import pallas as pl
from jax.experimental.pallas import tpu as pltpu

_INV_SQRT2 = 1.0 / math.sqrt(2.0)
_LANES = 512            # lane-dense last dim (multiple of 128)
_MAX_BLOCK_ROWS = 1024  # 1024 x 512 x 4 B = 2 MiB per buffer


# ---------------- Pallas kernel: exact (erf-based) GELU ----------------------
def gelu_kernel(x_ref, o_ref):
    x = x_ref[...]
    o_ref[...] = x * 0.5 * (1.0 + lax.erf(x * _INV_SQRT2))


# ---------------- wrapper ----------------------------------------------------
def gelu(x):
    """Elementwise exact GELU of an arbitrarily-shaped array via Pallas."""
    orig_shape = x.shape
    orig_dtype = x.dtype

    xf = x.reshape(-1).astype(jnp.float32)
    n = xf.shape[0]

    # Lane-dense 2-D layout: (rows, 512); rows padded to a block multiple.
    rows = pl.cdiv(n, _LANES)
    block_rows = min(_MAX_BLOCK_ROWS, ((rows + 7) // 8) * 8)  # >= (8,128) tile
    rows_pad = pl.cdiv(rows, block_rows) * block_rows
    n_pad = rows_pad * _LANES

    xp = jnp.pad(xf, (0, n_pad - n)).reshape(rows_pad, _LANES)

    out = pl.pallas_call(
        gelu_kernel,
        out_shape=jax.ShapeDtypeStruct((rows_pad, _LANES), jnp.float32),
        grid=(rows_pad // block_rows,),
        in_specs=[pl.BlockSpec((block_rows, _LANES), lambda i: (i, 0))],
        out_specs=pl.BlockSpec((block_rows, _LANES), lambda i: (i, 0)),
        compiler_params=pltpu.CompilerParams(
            dimension_semantics=("parallel",)),
    )(xp)

    return out.reshape(-1)[:n].reshape(orig_shape).astype(orig_dtype)


# ---------------- pure-JAX reference (for sanity check) ----------------------
def _gelu_ref(x):
    xf = x.astype(jnp.float32)
    return (xf * 0.5 * (1.0 + lax.erf(xf * _INV_SQRT2))).astype(x.dtype)


if __name__ == "__main__":
    key = jax.random.PRNGKey(0)
    x = jax.random.normal(key, (2, 4, 16, 16), dtype=jnp.float32)

    out = jax.block_until_ready(gelu(x))
    assert out.shape == x.shape, out.shape
    assert out.dtype == x.dtype, out.dtype

    ref = jax.block_until_ready(_gelu_ref(x))
    np.testing.assert_allclose(np.asarray(out), np.asarray(ref),
                               rtol=1e-6, atol=1e-6)

    # also matches jax.nn.gelu with exact (non-tanh) formulation
    ref2 = jax.block_until_ready(jax.nn.gelu(x, approximate=False))
    np.testing.assert_allclose(np.asarray(out), np.asarray(ref2),
                               rtol=1e-5, atol=1e-5)

    print("KERNEL_OK")
</pallas_src>

<mosaic_0001>
module attributes {stable_mosaic.version = 11 : i64} {
  func.func @gelu_kernel(%arg0: i32, %arg1: memref<8x512xf32, #tpu.memory_space<vmem>>, %arg2: memref<8x512xf32, #tpu.memory_space<vmem>>) attributes {dimension_semantics = [#tpu.dimension_semantics<parallel>], iteration_bounds = array<i64: 1>, scalar_prefetch = 0 : i64, scratch_operands = 0 : i64, tpu.core_type = #tpu.core_type<tc>, window_params = [{transform_indices = @transform_0, window_bounds = array<i64: 8, 512>}, {transform_indices = @transform_1, window_bounds = array<i64: 8, 512>}]} {
    %c0 = arith.constant 0 : index
    %c0_0 = arith.constant 0 : index
    %0 = vector.load %arg1[%c0, %c0_0] : memref<8x512xf32, #tpu.memory_space<vmem>>, vector<8x512xf32>
    %cst = arith.constant 5.000000e-01 : f32
    %1 = vector.broadcast %cst : f32 to vector<8x512xf32>
    %2 = arith.mulf %0, %1 : vector<8x512xf32>
    %cst_1 = arith.constant 0.707106769 : f32
    %3 = vector.broadcast %cst_1 : f32 to vector<8x512xf32>
    %4 = arith.mulf %0, %3 : vector<8x512xf32>
    %5 = math.erf %4 : vector<8x512xf32>
    %cst_2 = arith.constant 1.000000e+00 : f32
    %6 = vector.broadcast %cst_2 : f32 to vector<8x512xf32>
    %7 = arith.addf %6, %5 : vector<8x512xf32>
    %8 = arith.mulf %2, %7 : vector<8x512xf32>
    %c0_3 = arith.constant 0 : index
    %c0_4 = arith.constant 0 : index
    %9 = vector.load %arg2[%c0_3, %c0_4] : memref<8x512xf32, #tpu.memory_space<vmem>>, vector<8x512xf32>
    tpu.vector_store %arg2[%c0_3, %c0_4], %8 {strides = array<i32>} : memref<8x512xf32, #tpu.memory_space<vmem>>, vector<8x512xf32>,
    return
  }
  func.func @transform_0(%arg0: i32) -> (i32, i32) {
    %c0_i32 = arith.constant 0 : i32
    %c0_i32_0 = arith.constant 0 : i32
    return %arg0, %c0_i32 : i32, i32
  }
  func.func @transform_1(%arg0: i32) -> (i32, i32) {
    %c0_i32 = arith.constant 0 : i32
    %c0_i32_0 = arith.constant 0 : i32
    return %arg0, %c0_i32 : i32, i32
  }
}

</mosaic_0001>

<bundles_post_ra>
// kernel: tpu_custom_call.1
= control target key start
LH: loop header
LB: loop body
LE: loop exit
PB: predicated region body
PF: predicated region fallthrough
CT: control target
= control target key end

     0   :  { %6 = vsyncpa [#allocation3], 0  ;;  %s158_s0 = inlined_call_operand.hbm [shape: f32[8,512], index: 0, kind: input, shape index: {}]   ;;  %s159_s1 = inlined_call_operand.hbm [shape: f32[8,512], index: 1, kind: output, shape index: {}]  }
   0x1   :  { %7 = vsyncpa [#allocation4], 0  ;;  %s122_s6 = smov [#allocation2]   ;;  %s74_s10 = scalar_lea.hbm %s158_s0, 512 }
   0x2   :  { %s14_s7 = sshll.u32 %s122_s6, 4  ;;  %p75_p0 = scmp.ne.s32.totalorder %s158_s0, %s74_s10  ;;  %s15_s7 = int_to_ptr.vmem [resolvable:$true] %s14_s7 }
   0x3   :  { %p78_p1 = scmp.lt.u32.totalorder %s74_s10, %s158_s0 }
   0x5   :  { %p80_p2 = pnand %p78_p1, %p75_p0 }
   0x7   :  { %83 = shalt.err (!%p80_p2)
}
   0x8   :  { %s84_s15 = scalar_lea.vmem %s15_s7, 512  ;;  %p89_p4 = scmp.lt.s32.totalorder %s15_s7, %s15_s7 }
   0x9   :  { %p85_p3 = scmp.ne.s32.totalorder %s15_s7, %s84_s15  ;;  %p90_p5 = scmp.lt.s32.totalorder %s84_s15, %s84_s15 }
   0xb   :  { %p91_p6 = por %p90_p5, %p89_p4 }
   0xd   :  { %p92_p7 = pnand %p91_p6, %p85_p3 }
   0xf   :  { %95 = shalt.err (!%p92_p7)
}
  0x10   :  { %17 = dma.hbm_to_vmem [thread:$0]  %s158_s0, 512, %s15_s7, [#allocation3]  }
  0x11   :  { %118 = dma.done.wait [#allocation3], 512  }
  0x12   :  { %119 = vsyncadd [#allocation3], 4294966784  ;;  %v21_v0 = vld [vmem:[#allocation2] sm:$0xff]  ;;  %v22_v1 = vld [vmem:[#allocation2 + $0x8] sm:$0xff]  ;;  %s123_s0 = smov [#allocation5]  }
  0x13   :  { %v23_v2 = vld [vmem:[#allocation2 + $0x10] sm:$0xff]  ;;  %v29_v3 = vmul.f32 0.70710677, %v21_v0  ;;  %v30_v4 = vmul.f32 0.70710677, %v22_v1  ;;  %v24_v6 = vld [vmem:[#allocation2 + $0x18] sm:$0xff] }
  0x14   :  { %v31_v5 = vmul.f32 0.70710677, %v23_v2  ;;  %v32_v7 = vmul.f32 0.70710677, %v24_v6  ;;  %v25_v8 = vmul.f32 0.5, %v21_v0  ;;  %v26_v10 = vmul.f32 0.5, %v22_v1 }
  0x15   :  { %66 = verf.f32 %v29_v3  ;;  %v27_v13 = vmul.f32 0.5, %v23_v2  ;;  %v28_v16 = vmul.f32 0.5, %v24_v6  ;;  %s55_s18 = sshll.u32 %s123_s0, 4  ;;  %s56_s18 = int_to_ptr.vmem [resolvable:$true] %s55_s18 }
  0x16   :  { %68 = verf.f32 %v30_v4  ;;  %s96_s19 = scalar_lea.vmem %s56_s18, 512  ;;  %p101_p9 = scmp.lt.s32.totalorder %s56_s18, %s56_s18 }
  0x17   :  { %70 = verf.f32 %v31_v5  ;;  %p97_p8 = scmp.ne.s32.totalorder %s56_s18, %s96_s19  ;;  %p102_p10 = scmp.lt.s32.totalorder %s96_s19, %s96_s19 }
  0x18   :  { %72 = verf.f32 %v32_v7 }
  0x19   :  { %p103_p11 = por %p102_p10, %p101_p9 }
  0x1b   :  { %p104_p12 = pnand %p103_p11, %p97_p8 }
  0x1f   :  { %v67_v9 = vpop.eup %66 }
  0x20   :  { %v69_v11 = vpop.eup %68  ;;  %v37_v12 = vadd.f32 1.0, %v67_v9 }
  0x21   :  { %v71_v14 = vpop.eup %70  ;;  %v38_v15 = vadd.f32 1.0, %v69_v11 }
  0x22   :  { %v73_v17 = vpop.eup %72  ;;  %v41_v18 = vmul.f32 %v37_v12, %v25_v8  ;;  %v39_v19 = vadd.f32 1.0, %v71_v14 }
  0x23   :  { %v42_v20 = vmul.f32 %v38_v15, %v26_v10  ;;  %v40_v21 = vadd.f32 1.0, %v73_v17 }
  0x24   :  { %45 = vst [vmem:[#allocation5] sm:$0xff] %v41_v18  ;;  %v43_v22 = vmul.f32 %v39_v19, %v27_v13 }
  0x25   :  { %46 = vst [vmem:[#allocation5 + $0x8] sm:$0xff] %v42_v20  ;;  %v44_v23 = vmul.f32 %v40_v21, %v28_v16 }
  0x26   :  { %47 = vst [vmem:[#allocation5 + $0x10] sm:$0xff] %v43_v22 }
  0x27   :  { %48 = vst [vmem:[#allocation5 + $0x18] sm:$0xff] %v44_v23 }
  0x28   :  { %107 = shalt.err (!%p104_p12)
}
  0x29   :  { %s108_s22 = scalar_lea.hbm %s159_s1, 512 }
  0x2a   :  { %p109_p13 = scmp.ne.s32.totalorder %s159_s1, %s108_s22  ;;  %p112_p0 = scmp.lt.u32.totalorder %s108_s22, %s159_s1 }
  0x2c   :  { %p114_p1 = pnand %p112_p0, %p109_p13 }
  0x2e   :  { %117 = shalt.err (!%p114_p1)
}
  0x2f   :  { %58 = dma.vmem_to_hbm [thread:$0]  %s56_s18, 512, %s159_s1, [#allocation4]  }
  0x30   :  { %120 = dma.done.wait [#allocation4], 512  }
  0x31   :  { %121 = vsyncadd [#allocation4], 4294966784 }
  0x32   :  { %62 = vsyncpa [#allocation3], 1 }
  0x33   :  { %63 = vsyncpa [#allocation4], 1 }

</bundles_post_ra>
